<compile_context>
chip_gen: v7x
topology: tpu7x:2x2x1
jax: 0.10.0
libtpu: 0.0.40
codegen_flags: <defaults>
</compile_context>

<pallas_src>
import jax
import jax.numpy as jnp
from jax import lax
from jax.experimental import pallas as pl
from jax.experimental.pallas import tpu as pltpu

HIDDEN = 128
LANE = 128
BN_EPS = 1e-5


def _full_spec(shape):
    # One closure per call -> no shared loop-variable cell.
    return pl.BlockSpec(shape, lambda: (0,) * len(shape))


def dqn_kernel(x_ref, w1_ref, w2_ref, w3_ref, vec_ref, o_ref):
    # Fused (8, 128) f32 vector tile row layout:
    #   0: b1, 1: b2, 2: gamma, 3: beta, 4: b3 (lane-padded), 5..7: unused
    b1 = vec_ref[0:1, :]
    b2 = vec_ref[1:2, :]
    gamma = vec_ref[2:3, :]
    beta = vec_ref[3:4, :]
    b3 = vec_ref[4:5, :]

    # ---- f1 + ReLU ----------------------------------------------------------
    # input_dim is tiny (<=16 expected for this DQN), so do the contraction as
    # an unrolled per-column multiply-add on the VPU in f32: no K padding, no
    # bf16 cast of x, exact f32 math for the first layer.
    x = x_ref[...]            # (batch, input_dim) f32
    w1 = w1_ref[...]          # (input_dim, 128)   f32
    input_dim = x.shape[1]
    h1 = x[:, 0:1] * w1[0:1, :]
    for k in range(1, input_dim):                 # static, fully unrolled
        h1 = h1 + x[:, k:k + 1] * w1[k:k + 1, :]
    h1 = jnp.maximum(h1 + b1, 0.0)                # (batch, 128) f32

    # ---- f2 (bf16 MXU operands, f32 accumulation) ---------------------------
    h2 = jnp.dot(h1.astype(w2_ref.dtype), w2_ref[...],
                 preferred_element_type=jnp.float32) + b2

    # ---- BatchNorm1d (training mode: batch stats, biased variance), f32 -----
    mean = jnp.mean(h2, axis=0, keepdims=True)
    diff = h2 - mean
    var = jnp.mean(diff * diff, axis=0, keepdims=True)
    h2n = diff * lax.rsqrt(var + BN_EPS)
    h2n = jnp.maximum(h2n * gamma + beta, 0.0)

    # ---- head (lane-dense 128-wide padded output) ----------------------------
    out = jnp.dot(h2n.astype(w3_ref.dtype), w3_ref[...],
                  preferred_element_type=jnp.float32) + b3
    o_ref[...] = out.astype(o_ref.dtype)


def prepare_params(params, *, mxu_dtype=jnp.bfloat16):
    """One-time parameter preparation (do NOT call per forward step)."""
    action_size = params["w3"].shape[1]
    assert action_size <= LANE, "head wider than one lane tile not implemented"
    assert params["w1"].shape[0] <= 16, "VPU layer-1 path expects a small input_dim"

    # lane-pad the head output dim once (exact: zero columns)
    w3_pad = jnp.pad(params["w3"], ((0, 0), (0, LANE - action_size)))
    b3_pad = jnp.pad(params["b3"], ((0, 0), (0, LANE - action_size)))

    # fuse the five (1,128) row vectors into a single aligned (8,128) f32 tile
    vec = jnp.concatenate(
        [params["b1"], params["b2"], params["gamma"], params["beta"], b3_pad],
        axis=0)
    vec = jnp.pad(vec, ((0, 8 - vec.shape[0]), (0, 0))).astype(jnp.float32)

    return {
        "w1": params["w1"].astype(jnp.float32),   # (input_dim, 128) f32 (VPU path)
        "w2": params["w2"].astype(mxu_dtype),     # (128, 128) bf16
        "w3": w3_pad.astype(mxu_dtype),           # (128, 128) bf16 (lane-padded)
        "vec": vec,                               # (8, 128)   f32 fused vectors
        "action_size": action_size,               # python int
    }


def make_dqn_forward(prepped):
    """Returns a jitted forward(x) closure; only x moves per call."""
    w1, w2, w3, vec = prepped["w1"], prepped["w2"], prepped["w3"], prepped["vec"]
    action_size = prepped["action_size"]

    @jax.jit
    def forward(x):
        batch = x.shape[0]
        out_pad = pl.pallas_call(
            dqn_kernel,
            out_shape=jax.ShapeDtypeStruct((batch, LANE), jnp.float32),
            grid=(),
            in_specs=[
                _full_spec(x.shape),
                _full_spec(w1.shape),
                _full_spec(w2.shape),
                _full_spec(w3.shape),
                _full_spec(vec.shape),
            ],
            out_specs=_full_spec((batch, LANE)),
            compiler_params=pltpu.CompilerParams(vmem_limit_bytes=32 << 20),
        )(x, w1, w2, w3, vec)
        # slice the lane-padded head back to the real action dimension
        return out_pad[:, :action_size]

    return forward


def init_params(key, input_dim, action_size):
    ks = jax.random.split(key, 8)
    scale = 0.1
    return {
        "w1": scale * jax.random.normal(ks[0], (input_dim, HIDDEN), jnp.float32),
        "b1": scale * jax.random.normal(ks[1], (1, HIDDEN), jnp.float32),
        "w2": scale * jax.random.normal(ks[2], (HIDDEN, HIDDEN), jnp.float32),
        "b2": scale * jax.random.normal(ks[3], (1, HIDDEN), jnp.float32),
        "gamma": 1.0 + scale * jax.random.normal(ks[4], (1, HIDDEN), jnp.float32),
        "beta": scale * jax.random.normal(ks[5], (1, HIDDEN), jnp.float32),
        "w3": scale * jax.random.normal(ks[6], (HIDDEN, action_size), jnp.float32),
        "b3": scale * jax.random.normal(ks[7], (1, action_size), jnp.float32),
    }


def dqn_reference_f32(x, p):
    """Pure-f32 reference (matches the PyTorch module semantics)."""
    h1 = jnp.maximum(x @ p["w1"] + p["b1"], 0.0)
    h2 = h1 @ p["w2"] + p["b2"]
    mean = jnp.mean(h2, axis=0, keepdims=True)
    var = jnp.mean((h2 - mean) ** 2, axis=0, keepdims=True)
    h2n = jnp.maximum(
        (h2 - mean) * lax.rsqrt(var + BN_EPS) * p["gamma"] + p["beta"], 0.0)
    return h2n @ p["w3"] + p["b3"]


def dqn_reference_mirror(x, p, mxu_dtype=jnp.bfloat16):
    """Reference mirroring the kernel recipe: f32 layer 1, bf16 MXU layers 2/3."""
    def mm(a, b):
        return jnp.dot(a.astype(mxu_dtype), b.astype(mxu_dtype),
                       preferred_element_type=jnp.float32)
    h1 = jnp.maximum(x @ p["w1"] + p["b1"], 0.0)
    h2 = mm(h1, p["w2"]) + p["b2"]
    mean = jnp.mean(h2, axis=0, keepdims=True)
    var = jnp.mean((h2 - mean) ** 2, axis=0, keepdims=True)
    h2n = jnp.maximum(
        (h2 - mean) * lax.rsqrt(var + BN_EPS) * p["gamma"] + p["beta"], 0.0)
    return mm(h2n, p["w3"]) + p["b3"]


if __name__ == "__main__":
    key = jax.random.PRNGKey(0)
    k_param, k_x = jax.random.split(key)

    batch, input_dim, action_size = 8, 4, 4
    params = init_params(k_param, input_dim, action_size)
    x = jax.random.normal(k_x, (batch, input_dim), jnp.float32)

    prepped = jax.tree_util.tree_map(
        lambda a: jax.block_until_ready(a) if isinstance(a, jnp.ndarray) else a,
        prepare_params(params))                     # one-time weight prep
    dqn_forward = make_dqn_forward(prepped)          # jitted; only x moves per call

    out = jax.block_until_ready(dqn_forward(x))
    assert out.shape == (batch, action_size)

    # Tight check against a reference using the same mixed-precision recipe.
    ref_mirror = dqn_reference_mirror(x, params)
    assert jnp.allclose(out, ref_mirror, atol=1e-3, rtol=1e-3), "mismatch vs mirror ref"

    # Looser check against the pure-f32 PyTorch-semantics reference.
    ref_f32 = dqn_reference_f32(x, params)
    assert jnp.allclose(out, ref_f32, atol=5e-2, rtol=5e-2), "mismatch vs f32 ref"

    print("KERNEL_OK")
</pallas_src>

<mosaic_0001>
module attributes {stable_mosaic.version = 11 : i64} {
  func.func @dqn_kernel(%arg0: memref<8x4xf32, #tpu.memory_space<vmem>>, %arg1: memref<4x128xf32, #tpu.memory_space<vmem>>, %arg2: memref<128x128xbf16, #tpu.memory_space<vmem>>, %arg3: memref<128x128xbf16, #tpu.memory_space<vmem>>, %arg4: memref<8x128xf32, #tpu.memory_space<vmem>>, %arg5: memref<8x128xf32, #tpu.memory_space<vmem>>) attributes {dimension_semantics = [], scalar_prefetch = 0 : i64, scratch_operands = 0 : i64, tpu.core_type = #tpu.core_type<tc>} {
    %c0 = arith.constant 0 : index
    %c0_0 = arith.constant 0 : index
    %0 = vector.load %arg4[%c0, %c0_0] : memref<8x128xf32, #tpu.memory_space<vmem>>, vector<1x128xf32>
    %c1 = arith.constant 1 : index
    %c0_1 = arith.constant 0 : index
    %1 = vector.load %arg4[%c1, %c0_1] : memref<8x128xf32, #tpu.memory_space<vmem>>, vector<1x128xf32>
    %c2 = arith.constant 2 : index
    %c0_2 = arith.constant 0 : index
    %2 = vector.load %arg4[%c2, %c0_2] : memref<8x128xf32, #tpu.memory_space<vmem>>, vector<1x128xf32>
    %c3 = arith.constant 3 : index
    %c0_3 = arith.constant 0 : index
    %3 = vector.load %arg4[%c3, %c0_3] : memref<8x128xf32, #tpu.memory_space<vmem>>, vector<1x128xf32>
    %c4 = arith.constant 4 : index
    %c0_4 = arith.constant 0 : index
    %4 = vector.load %arg4[%c4, %c0_4] : memref<8x128xf32, #tpu.memory_space<vmem>>, vector<1x128xf32>
    %c0_5 = arith.constant 0 : index
    %c0_6 = arith.constant 0 : index
    %5 = vector.load %arg0[%c0_5, %c0_6] : memref<8x4xf32, #tpu.memory_space<vmem>>, vector<8x4xf32>
    %c0_7 = arith.constant 0 : index
    %c0_8 = arith.constant 0 : index
    %6 = vector.load %arg1[%c0_7, %c0_8] : memref<4x128xf32, #tpu.memory_space<vmem>>, vector<4x128xf32>
    %7 = vector.extract_strided_slice %5 {offsets = [0, 0], sizes = [8, 1], strides = [1, 1]} : vector<8x4xf32> to vector<8x1xf32>
    %8 = vector.extract_strided_slice %6 {offsets = [0, 0], sizes = [1, 128], strides = [1, 1]} : vector<4x128xf32> to vector<1x128xf32>
    %9 = vector.broadcast %7 : vector<8x1xf32> to vector<8x128xf32>
    %10 = vector.broadcast %8 : vector<1x128xf32> to vector<8x128xf32>
    %11 = arith.mulf %9, %10 : vector<8x128xf32>
    %12 = vector.extract_strided_slice %5 {offsets = [0, 1], sizes = [8, 1], strides = [1, 1]} : vector<8x4xf32> to vector<8x1xf32>
    %13 = vector.extract_strided_slice %6 {offsets = [1, 0], sizes = [1, 128], strides = [1, 1]} : vector<4x128xf32> to vector<1x128xf32>
    %14 = vector.broadcast %12 : vector<8x1xf32> to vector<8x128xf32>
    %15 = vector.broadcast %13 : vector<1x128xf32> to vector<8x128xf32>
    %16 = arith.mulf %14, %15 : vector<8x128xf32>
    %17 = arith.addf %11, %16 : vector<8x128xf32>
    %18 = vector.extract_strided_slice %5 {offsets = [0, 2], sizes = [8, 1], strides = [1, 1]} : vector<8x4xf32> to vector<8x1xf32>
    %19 = vector.extract_strided_slice %6 {offsets = [2, 0], sizes = [1, 128], strides = [1, 1]} : vector<4x128xf32> to vector<1x128xf32>
    %20 = vector.broadcast %18 : vector<8x1xf32> to vector<8x128xf32>
    %21 = vector.broadcast %19 : vector<1x128xf32> to vector<8x128xf32>
    %22 = arith.mulf %20, %21 : vector<8x128xf32>
    %23 = arith.addf %17, %22 : vector<8x128xf32>
    %24 = vector.extract_strided_slice %5 {offsets = [0, 3], sizes = [8, 1], strides = [1, 1]} : vector<8x4xf32> to vector<8x1xf32>
    %25 = vector.extract_strided_slice %6 {offsets = [3, 0], sizes = [1, 128], strides = [1, 1]} : vector<4x128xf32> to vector<1x128xf32>
    %26 = vector.broadcast %24 : vector<8x1xf32> to vector<8x128xf32>
    %27 = vector.broadcast %25 : vector<1x128xf32> to vector<8x128xf32>
    %28 = arith.mulf %26, %27 : vector<8x128xf32>
    %29 = arith.addf %23, %28 : vector<8x128xf32>
    %30 = vector.broadcast %0 : vector<1x128xf32> to vector<8x128xf32>
    %31 = arith.addf %29, %30 : vector<8x128xf32>
    %cst = arith.constant 0.000000e+00 : f32
    %32 = vector.broadcast %cst : f32 to vector<8x128xf32>
    %33 = arith.maximumf %31, %32 : vector<8x128xf32>
    %34 = arith.truncf %33 : vector<8x128xf32> to vector<8x128xbf16>
    %c0_9 = arith.constant 0 : index
    %c0_10 = arith.constant 0 : index
    %35 = vector.load %arg2[%c0_9, %c0_10] : memref<128x128xbf16, #tpu.memory_space<vmem>>, vector<128x128xbf16>
    %cst_11 = arith.constant dense<0.000000e+00> : vector<8x128xf32>
    %36 = tpu.matmul %34, %35, %cst_11 {dimension_numbers = #tpu.dot_dimension_numbers<[1], [0], [0], [1], [0, 0, 1, 1], [], []>} : vector<8x128xbf16>, vector<128x128xbf16>, vector<8x128xf32> -> vector<8x128xf32>
    %37 = vector.broadcast %1 : vector<1x128xf32> to vector<8x128xf32>
    %38 = arith.addf %36, %37 : vector<8x128xf32>
    %cst_12 = arith.constant dense<0.000000e+00> : vector<128xf32>
    %39 = vector.multi_reduction <add>, %38, %cst_12 [0] : vector<8x128xf32> to vector<128xf32>
    %40 = vector.shape_cast %39 : vector<128xf32> to vector<1x128xf32>
    %cst_13 = arith.constant 8.000000e+00 : f32
    %41 = vector.broadcast %cst_13 : f32 to vector<1x128xf32>
    %42 = arith.divf %40, %41 : vector<1x128xf32>
    %43 = vector.broadcast %42 : vector<1x128xf32> to vector<8x128xf32>
    %44 = arith.subf %38, %43 : vector<8x128xf32>
    %45 = arith.mulf %44, %44 : vector<8x128xf32>
    %cst_14 = arith.constant dense<0.000000e+00> : vector<128xf32>
    %46 = vector.multi_reduction <add>, %45, %cst_14 [0] : vector<8x128xf32> to vector<128xf32>
    %47 = vector.shape_cast %46 : vector<128xf32> to vector<1x128xf32>
    %cst_15 = arith.constant 8.000000e+00 : f32
    %48 = vector.broadcast %cst_15 : f32 to vector<1x128xf32>
    %49 = arith.divf %47, %48 : vector<1x128xf32>
    %cst_16 = arith.constant 9.99999974E-6 : f32
    %50 = vector.broadcast %cst_16 : f32 to vector<1x128xf32>
    %51 = arith.addf %49, %50 : vector<1x128xf32>
    %52 = math.rsqrt %51 : vector<1x128xf32>
    %53 = vector.broadcast %52 : vector<1x128xf32> to vector<8x128xf32>
    %54 = arith.mulf %44, %53 : vector<8x128xf32>
    %55 = vector.broadcast %2 : vector<1x128xf32> to vector<8x128xf32>
    %56 = arith.mulf %54, %55 : vector<8x128xf32>
    %57 = vector.broadcast %3 : vector<1x128xf32> to vector<8x128xf32>
    %58 = arith.addf %56, %57 : vector<8x128xf32>
    %cst_17 = arith.constant 0.000000e+00 : f32
    %59 = vector.broadcast %cst_17 : f32 to vector<8x128xf32>
    %60 = arith.maximumf %58, %59 : vector<8x128xf32>
    %61 = arith.truncf %60 : vector<8x128xf32> to vector<8x128xbf16>
    %c0_18 = arith.constant 0 : index
    %c0_19 = arith.constant 0 : index
    %62 = vector.load %arg3[%c0_18, %c0_19] : memref<128x128xbf16, #tpu.memory_space<vmem>>, vector<128x128xbf16>
    %cst_20 = arith.constant dense<0.000000e+00> : vector<8x128xf32>
    %63 = tpu.matmul %61, %62, %cst_20 {dimension_numbers = #tpu.dot_dimension_numbers<[1], [0], [0], [1], [0, 0, 1, 1], [], []>} : vector<8x128xbf16>, vector<128x128xbf16>, vector<8x128xf32> -> vector<8x128xf32>
    %64 = vector.broadcast %4 : vector<1x128xf32> to vector<8x128xf32>
    %65 = arith.addf %63, %64 : vector<8x128xf32>
    %c0_21 = arith.constant 0 : index
    %c0_22 = arith.constant 0 : index
    %66 = vector.load %arg5[%c0_21, %c0_22] : memref<8x128xf32, #tpu.memory_space<vmem>>, vector<8x128xf32>
    tpu.vector_store %arg5[%c0_21, %c0_22], %65 {strides = array<i32>} : memref<8x128xf32, #tpu.memory_space<vmem>>, vector<8x128xf32>,
    return
  }
}

</mosaic_0001>

<bundles_post_ra>
// kernel: forward.1
= control target key start
LH: loop header
LB: loop body
LE: loop exit
PB: predicated region body
PF: predicated region fallthrough
CT: control target
= control target key end

     0   :  { %10 = vsyncpa [#allocation3], 0  ;;  %s624_s0 = inlined_call_operand.vmem [shape: f32[8,4], index: 0, kind: input, shape index: {}]   ;;  %s625_s1 = inlined_call_operand.vmem [shape: f32[4,128], index: 1, kind: input, shape index: {}]   ;;  %s626_s2 = inlined_call_operand.hbm [shape: bf16[128,128], index: 2, kind: input, shape index: {}]   ;;  %s627_s3 = inlined_call_operand.hbm [shape: bf16[128,128], index: 3, kind: input, shape index: {}]   ;;  %s628_s4 = inlined_call_operand.vmem [shape: f32[8,128], index: 4, kind: input, shape index: {}]   ;;  %s629_s5 = inlined_call_operand.vmem [shape: f32[8,128], index: 5, kind: output, shape index: {}]  }
   0x1   :  { %11 = vsyncpa [#allocation5], 0  ;;  %s518_s18 = smov [#allocation2]   ;;  %s470_s22 = scalar_lea.hbm %s626_s2, 1024 }
   0x2   :  { %s21_s19 = sshll.u32 %s518_s18, 4  ;;  %p471_p0 = scmp.ne.s32.totalorder %s626_s2, %s470_s22  ;;  %s22_s19 = int_to_ptr.vmem [resolvable:$true] %s21_s19 }
   0x3   :  { %p474_p1 = scmp.lt.u32.totalorder %s470_s22, %s626_s2 }
   0x5   :  { %p476_p2 = pnand %p474_p1, %p471_p0 }
   0x7   :  { %479 = shalt.err (!%p476_p2)
}
   0x8   :  { %s480_s27 = scalar_lea.vmem %s22_s19, 1024  ;;  %p485_p4 = scmp.lt.s32.totalorder %s22_s19, %s22_s19 }
   0x9   :  { %p481_p3 = scmp.ne.s32.totalorder %s22_s19, %s480_s27  ;;  %p486_p5 = scmp.lt.s32.totalorder %s480_s27, %s480_s27 }
   0xb   :  { %p487_p6 = por %p486_p5, %p485_p4 }
   0xd   :  { %p488_p7 = pnand %p487_p6, %p481_p3 }
   0xf   :  { %491 = shalt.err (!%p488_p7)
}
  0x10   :  { %s519_s28 = smov 64   ;;  %s520_s29 = smov 4  }
  0x11   :  { %27 = dma.hbm_to_vmem [thread:$0]  %s626_s2, 1024, %s22_s19, [#allocation3], %s519_s28, %s519_s28, %s520_s29  }
  0x12   :  { %s521_s7 = smov [#allocation4]   ;;  %s492_s11 = scalar_lea.hbm %s627_s3, 1024 }
  0x13   :  { %s33_s8 = sshll.u32 %s521_s7, 4  ;;  %p493_p8 = scmp.ne.s32.totalorder %s627_s3, %s492_s11  ;;  %s34_s8 = int_to_ptr.vmem [resolvable:$true] %s33_s8 }
  0x14   :  { %p496_p9 = scmp.lt.u32.totalorder %s492_s11, %s627_s3 }
  0x16   :  { %p498_p10 = pnand %p496_p9, %p493_p8 }
  0x18   :  { %501 = shalt.err (!%p498_p10)
}
  0x19   :  { %s502_s16 = scalar_lea.vmem %s34_s8, 1024  ;;  %p507_p12 = scmp.lt.s32.totalorder %s34_s8, %s34_s8 }
  0x1a   :  { %p503_p11 = scmp.ne.s32.totalorder %s34_s8, %s502_s16  ;;  %p508_p13 = scmp.lt.s32.totalorder %s502_s16, %s502_s16 }
  0x1c   :  { %p509_p0 = por %p508_p13, %p507_p12 }
  0x1e   :  { %p510_p1 = pnand %p509_p0, %p503_p11 }
  0x20   :  { %513 = shalt.err (!%p510_p1)
}
  0x21   :  { %39 = dma.hbm_to_vmem [thread:$0]  %s627_s3, 1024, %s34_s8, [#allocation5], %s519_s28, %s519_s28, %s520_s29  }
  0x22   :  { %514 = dma.done.wait [#allocation3], 1024  }
  0x23   :  { %515 = vsyncadd [#allocation3], 4294966272 }
  0x24   :  { %516 = dma.done.wait [#allocation5], 1024  }
  0x25   :  { %517 = vsyncadd [#allocation5], 4294966272  ;;  %v522_v0 = vmov 0   ;;  %v523_v1 = vmov 2   ;;  %v524_v2 = vmov 0.0   ;;  %v54_v3 = vld [vmem:[%s624_s0] sm:$0xff]  ;;  %v61_v14 = vlaneseq }
  0x26   :  { %447 = vset.pattern.permute.xlu0 %v522_v0  ;;  %449 = vset.pattern.permute.xlu1 %v523_v1  ;;  %v452_v4 = vld [vmem:[#allocation2] sm:$0xff]   ;;  %v453_v5 = vld [vmem:[#allocation2 + $0x8] sm:$0xff]   ;;  %v525_v6 = vmov 1   ;;  %v526_v7 = vmov 3   ;;  %v454_v8 = vld [vmem:[#allocation2 + $0x10] sm:$0xff]   ;;  %vm527_vm0 = vmmov 0  }
  0x27   :  { %397 = vmatprep.subr.bf16.mxu0 %v524_v2  ;;  %417 = vmatprep.subr.bf16.mxu1 %v524_v2  ;;  %v455_v9 = vld [vmem:[#allocation2 + $0x18] sm:$0xff]   ;;  %v456_v10 = vld [vmem:[#allocation2 + $0x20] sm:$0xff]   ;;  %v457_v11 = vld [vmem:[#allocation2 + $0x28] sm:$0xff]   ;;  %v62_v15 = vshrl.u32 %v61_v14, 7 }
  0x28   :  { %58 = vperm.xlu0 %447, %v54_v3   ;;  %77 = vperm.xlu1 %449, %v54_v3   ;;  %v458_v12 = vld [vmem:[#allocation2 + $0x30] sm:$0xff]   ;;  %v459_v13 = vld [vmem:[#allocation2 + $0x38] sm:$0xff]   ;;  %v55_v18 = vld [vmem:[%s625_s1] sm:$0xf] }
  0x29   :  { %398 = vmatpush3.bf16.msra.mxu0 %v452_v4  ;;  %413 = vmatprep.mubr.msk.bf16.mxu0 %vm527_vm0, %v524_v2  ;;  %v63_v16 = vsub.s32 0, %v62_v15  ;;  %v72_v17 = vsub.s32 1, %v62_v15  ;;  %v82_v20 = vsub.s32 2, %v62_v15  ;;  %v92_v22 = vsub.s32 3, %v62_v15  ;;  %v358_v35 = vld [vmem:[%s628_s4] ss:$0 sm:$0xff] }
  0x2a   :  { %399 = vmatprep.subr.bf16.mxu0 %v524_v2  ;;  %433 = vmatprep.mubr.msk.bf16.mxu1 %vm527_vm0, %v524_v2  ;;  %v460_v40 = vld [vmem:[#allocation4] sm:$0xff]   ;;  %v461_v41 = vld [vmem:[#allocation4 + $0x8] sm:$0xff]   ;;  %v462_v42 = vld [vmem:[#allocation4 + $0x10] sm:$0xff]  }
  0x2b   :  { %v64_v23 = vrot.slane %v55_v18, %v63_v16  ;;  %v73_v24 = vrot.slane %v55_v18, %v72_v17  ;;  %v83_v25 = vrot.slane %v55_v18, %v82_v20  ;;  %v93_v26 = vrot.slane %v55_v18, %v92_v22  ;;  %418 = vmatpush3.bf16.msra.mxu1 %v460_v40  ;;  %v463_v43 = vld [vmem:[#allocation4 + $0x18] sm:$0xff]   ;;  %v464_v44 = vld [vmem:[#allocation4 + $0x20] sm:$0xff]   ;;  %v465_v45 = vld [vmem:[#allocation4 + $0x28] sm:$0xff]  }
  0x2c   :  { %448 = vset.pattern.permute.xlu0 %v525_v6  ;;  %450 = vset.pattern.permute.xlu1 %v526_v7  ;;  %v466_v46 = vld [vmem:[#allocation4 + $0x30] sm:$0xff]   ;;  %v467_v47 = vld [vmem:[#allocation4 + $0x38] sm:$0xff]   ;;  %v359_v48 = vld [vmem:[%s628_s4 + $0x1] ss:$0 sm:$0xff] }
  0x2d   :  { %67 = vperm.xlu0 %448, %v54_v3   ;;  %87 = vperm.xlu1 %450, %v54_v3   ;;  %v370_v15 = vld [vmem:[%s628_s4 + $0x4] ss:$0 sm:$0xff] }
  0x2e   :  { %400 = vmatpush3.bf16.msra.mxu0 %v453_v5  ;;  %419 = vmatprep.subr.bf16.mxu1 %v524_v2 }
  0x2f   :  { %401 = vmatprep.subr.bf16.mxu0 %v524_v2  ;;  %420 = vmatpush3.bf16.msra.mxu1 %v461_v41 }
  0x30   :  { %421 = vmatprep.subr.bf16.mxu1 %v524_v2 }
  0x31   :  { %451 = vset.pattern.permute.xlu0 %v526_v7 }
  0x32   :  { %402 = vmatpush3.bf16.msra.mxu0 %v454_v8  ;;  %v368_v8 = vld [vmem:[%s628_s4 + $0x2] ss:$0 sm:$0xff] }
  0x33   :  { %403 = vmatprep.subr.bf16.mxu0 %v524_v2  ;;  %422 = vmatpush3.bf16.msra.mxu1 %v462_v42 }
  0x34   :  { %423 = vmatprep.subr.bf16.mxu1 %v524_v2 }
  0x36   :  { %404 = vmatpush3.bf16.msra.mxu0 %v455_v9 }
  0x37   :  { %405 = vmatprep.subr.bf16.mxu0 %v524_v2  ;;  %424 = vmatpush3.bf16.msra.mxu1 %v463_v43 }
  0x38   :  { %425 = vmatprep.subr.bf16.mxu1 %v524_v2 }
  0x3a   :  { %406 = vmatpush3.bf16.msra.mxu0 %v456_v10  ;;  %v369_v10 = vld [vmem:[%s628_s4 + $0x3] ss:$0 sm:$0xff] }
  0x3b   :  { %407 = vmatprep.subr.bf16.mxu0 %v524_v2  ;;  %426 = vmatpush3.bf16.msra.mxu1 %v464_v44 }
  0x3c   :  { %427 = vmatprep.subr.bf16.mxu1 %v524_v2 }
  0x3e   :  { %408 = vmatpush3.bf16.msra.mxu0 %v457_v11 }
  0x3f   :  { %409 = vmatprep.subr.bf16.mxu0 %v524_v2  ;;  %428 = vmatpush3.bf16.msra.mxu1 %v465_v45 }
  0x40   :  { %429 = vmatprep.subr.bf16.mxu1 %v524_v2 }
  0x42   :  { %410 = vmatpush3.bf16.msra.mxu0 %v458_v12 }
  0x43   :  { %411 = vmatprep.subr.bf16.mxu0 %v524_v2  ;;  %430 = vmatpush3.bf16.msra.mxu1 %v466_v46 }
  0x44   :  { %431 = vmatprep.subr.bf16.mxu1 %v524_v2 }
  0x46   :  { %412 = vmatpush3.bf16.msra.mxu0 %v459_v13 }
  0x47   :  { %432 = vmatpush3.bf16.msra.mxu1 %v467_v47 }
  0xa7   :  { %v59_v19 = vpop.permute.xlu0 %58  ;;  %v78_v21 = vpop.permute.xlu1 %77 }
  0xa8   :  { %v65_v29 = vmul.f32 %v64_v23, %v59_v19  ;;  %v84_v31 = vmul.f32 %v83_v25, %v78_v21 }
  0xac   :  { %v68_v27 = vpop.permute.xlu0 %67  ;;  %v88_v28 = vpop.permute.xlu1 %87 }
  0xad   :  { %v74_v30 = vmul.f32 %v73_v24, %v68_v27  ;;  %v94_v33 = vmul.f32 %v93_v26, %v88_v28 }
  0xaf   :  { %v75_v32 = vadd.f32 %v74_v30, %v65_v29 }
  0xb1   :  { %v85_v34 = vadd.f32 %v84_v31, %v75_v32 }
  0xb3   :  { %v95_v36 = vadd.f32 %v94_v33, %v85_v34 }
  0xb5   :  { %v100_v37 = vadd.f32 %v358_v35, %v95_v36 }
  0xb7   :  { %v101_v38 = vmax.f32 %v100_v37, 0.0 }
  0xb9   :  { %v102_v39 = vpack.c.bf16 %v101_v38, %v101_v38 }
  0xbb   :  { %414 = vmatmul.mubr.bf16.vlgmr.msra.gmra.mrb[0].mxu0 %v102_v39 }
 0x18e   :  { %v205_v49 = vpop.f32.mrb[0].mxu0 }
 0x18f   :  { %v206_v50 = vadd.f32 %v359_v48, %v205_v49  ;;  %v415_v51 = vpop.f32.mrb[1].mxu0 }
 0x190   :  { %v208_v52 = vpop.f32.mrb[2].mxu0 }
 0x191   :  { %v211_v53 = vrot.slane %v206_v50, 4  ;;  %v416_v54 = vpop.f32.mrb[3].mxu0 }
 0x193   :  { %v212_v55 = vadd.f32 %v211_v53, %v206_v50 }
 0x195   :  { %v213_v56 = vrot.slane %v212_v55, 2 }
 0x197   :  { %v214_v57 = vadd.f32 %v213_v56, %v212_v55 }
 0x199   :  { %v215_v58 = vrot.slane %v214_v57, 1 }
 0x19b   :  { %v216_v59 = vadd.f32 %v215_v58, %v214_v57 }
 0x19d   :  { %v218_v60 = vmul.f32 0.125, %v216_v59 }
 0x19f   :  { %v219_v61 = vsub.f32 %v206_v50, %v218_v60 }
 0x1a1   :  { %v220_v62 = vmul.f32 %v219_v61, %v219_v61 }
 0x1a3   :  { %v221_v63 = vrot.slane %v220_v62, 4 }
 0x1a5   :  { %v222_v0 = vadd.f32 %v221_v63, %v220_v62 }
 0x1a7   :  { %v223_v1 = vrot.slane %v222_v0, 2 }
 0x1a9   :  { %v224_v2 = vadd.f32 %v223_v1, %v222_v0 }
 0x1ab   :  { %v225_v3 = vrot.slane %v224_v2, 1 }
 0x1ad   :  { %v226_v4 = vadd.f32 %v225_v3, %v224_v2 }
 0x1af   :  { %v227_v5 = vmul.f32 0.125, %v226_v4 }
 0x1b1   :  { %v228_v6 = vadd.f32 1e-05, %v227_v5 }
 0x1b3   :  { %468 = vrsqrt.f32 %v228_v6 }
 0x1bd   :  { %v469_v7 = vpop.eup %468 }
 0x1be   :  { %v230_v9 = vmul.f32 %v469_v7, %v219_v61 }
 0x1c0   :  { %v235_v11 = vmul.f32 %v368_v8, %v230_v9 }
 0x1c2   :  { %v240_v12 = vadd.f32 %v369_v10, %v235_v11 }
 0x1c4   :  { %v241_v13 = vmax.f32 %v240_v12, 0.0 }
 0x1c6   :  { %v242_v14 = vpack.c.bf16 %v241_v13, %v241_v13 }
 0x1c8   :  { %434 = vmatmul.mubr.bf16.vlgmr.msra.gmra.mrb[0].mxu1 %v242_v14 }
 0x29b   :  { %v345_v16 = vpop.f32.mrb[0].mxu1 }
 0x29c   :  { %v346_v17 = vadd.f32 %v370_v15, %v345_v16  ;;  %v435_v18 = vpop.f32.mrb[1].mxu1 }
 0x29d   :  { %v348_v19 = vpop.f32.mrb[2].mxu1 }
 0x29e   :  { %351 = vst [vmem:[%s629_s5] sm:$0xff] %v346_v17  ;;  %v436_v20 = vpop.f32.mrb[3].mxu1 }
 0x29f   :  { %356 = vsyncpa [#allocation3], 1 }
 0x2a0   :  { %357 = vsyncpa [#allocation5], 1 }

</bundles_post_ra>
